<compile_context>
chip_gen: v7x
topology: tpu7x:2x2x1
jax: 0.10.0
libtpu: 0.0.40
codegen_flags: <defaults>
</compile_context>

<pallas_src>
import functools

import jax
import jax.numpy as jnp
from jax.experimental import pallas as pl
from jax.experimental.pallas import tpu as pltpu


# ------------------------------- kernels ----------------------------------- #

def _project_kernel(x_ref, w_ref, alr_ref, feat_ref, el_ref, er_ref, *,
                    num_heads):
    """feat = x @ W; [el|er] = feat @ [blockdiag(attn_l)|blockdiag(attn_r)]."""
    feat = jnp.dot(x_ref[...], w_ref[...], preferred_element_type=jnp.float32)
    feat_ref[...] = feat
    scores = jnp.dot(feat, alr_ref[...], preferred_element_type=jnp.float32)
    el_ref[...] = scores[:, :num_heads]
    er_ref[...] = scores[:, num_heads:]


def _aggregate_kernel(er_ref, elt_ref, feat_ref, adjt_ref, b_ref, *rest,
                      num_heads, out_feats, residual):
    """Edge softmax + neighbor aggregation for one tile of destination nodes."""
    if residual:
        xres_ref, out_ref = rest
        xres = xres_ref[...]                # (T, H*out)
    else:
        (out_ref,) = rest
        xres = None

    # Additive mask computed ONCE per tile (head-invariant). Masked scores get
    # -1e30 and underflow to exactly 0 after exp(e - rowmax), so no second
    # where() is needed on the exp.  Precondition: every destination row in
    # adj_t has at least one edge (e.g. self-loops), as in DGL.
    adj_bias = jnp.where(adjt_ref[...] > 0,
                         jnp.float32(0.0), jnp.float32(-1e30))     # (T, N_src)

    er = er_ref[...]                        # (T, H)       dst-side scores
    elt = elt_ref[...]                      # (H, N_src)   src-side scores
    feat = feat_ref[...]                    # (N_src, H*out)
    bias = b_ref[...]                       # (H, out)

    cols = []
    for h in range(num_heads):              # heads are few and static
        e = er[:, h:h + 1] + elt[h:h + 1, :]                   # (T, N_src)
        e = jnp.where(e > 0, e, 0.2 * e)                       # LeakyReLU(0.2)
        e = e + adj_bias
        m = jnp.max(e, axis=-1, keepdims=True)
        p = jnp.exp(e - m)                                     # masked -> 0
        l = jnp.maximum(jnp.sum(p, axis=-1, keepdims=True),
                        jnp.float32(1e-20))                    # NaN guard
        alpha = p / l                                          # edge softmax

        fh = feat[:, h * out_feats:(h + 1) * out_feats]        # (N_src, out)
        rst = jnp.dot(alpha, fh, preferred_element_type=jnp.float32)

        if residual:
            # DGL residual with in_feats == num_heads*out_feats -> Identity res_fc
            rst = rst + xres[:, h * out_feats:(h + 1) * out_feats]

        rst = rst + bias[h:h + 1, :]
        rst = jnp.where(rst > 0, rst, jnp.expm1(rst))          # ELU
        cols.append(rst)

    # One full-width store per tile instead of num_heads narrow partial stores.
    out_ref[...] = jnp.concatenate(cols, axis=-1)


# ------------------------------- wrappers ----------------------------------- #

def _pick_tile(n, target):
    """Largest row tile <= target that divides n and is a multiple of 8."""
    if n <= target or n % 8 != 0:
        return n
    t = min(target, n)
    t -= t % 8
    while t >= 8:
        if n % t == 0:
            return t
        t -= 8
    return n


def _block_diag_attn(a, num_heads, out_feats):
    """(H, out) attention vector -> (H*out, H) block-diagonal projection matrix."""
    eye = jnp.eye(num_heads, dtype=a.dtype)                    # (H, H)
    return (a[:, :, None] * eye[:, None, :]).reshape(num_heads * out_feats,
                                                     num_heads)


def gat_layer(x, w, attn_l, attn_r, bias, adj_t, *, num_heads, out_feats,
              residual, tile_rows=256):
    n, in_feats = x.shape
    ho = num_heads * out_feats
    tile = _pick_tile(n, tile_rows)
    assert n % tile == 0
    grid = (n // tile,)
    par = pltpu.CompilerParams(dimension_semantics=("parallel",))

    # Block-diagonal attention projections, fused so BOTH score vectors come
    # from ONE MXU matmul of width 2*H.
    al_bd = _block_diag_attn(attn_l, num_heads, out_feats)     # (H*out, H)
    ar_bd = _block_diag_attn(attn_r, num_heads, out_feats)     # (H*out, H)
    alr_bd = jnp.concatenate([al_bd, ar_bd], axis=1)           # (H*out, 2H)

    # ---- kernel 1: feature projection + attention scores (row-tiled) ----
    proj = functools.partial(_project_kernel, num_heads=num_heads)
    feat, el, er = pl.pallas_call(
        proj,
        grid=grid,
        out_shape=(jax.ShapeDtypeStruct((n, ho), jnp.float32),
                   jax.ShapeDtypeStruct((n, num_heads), jnp.float32),
                   jax.ShapeDtypeStruct((n, num_heads), jnp.float32)),
        in_specs=[pl.BlockSpec((tile, in_feats), lambda i: (i, 0)),
                  pl.BlockSpec((in_feats, ho), lambda i: (0, 0)),        # resident
                  pl.BlockSpec((ho, 2 * num_heads), lambda i: (0, 0))],  # resident
        out_specs=(pl.BlockSpec((tile, ho), lambda i: (i, 0)),
                   pl.BlockSpec((tile, num_heads), lambda i: (i, 0)),
                   pl.BlockSpec((tile, num_heads), lambda i: (i, 0))),
        compiler_params=par,
    )(x, w, alr_bd)

    # Tiny layout plumbing so src-side scores broadcast along lanes.
    el_t = el.T                                                # (H, N)

    # ---- kernel 2: edge softmax + aggregation (dst-tiled, megacore-parallel) ----
    kernel = functools.partial(_aggregate_kernel, num_heads=num_heads,
                               out_feats=out_feats, residual=residual)
    in_specs = [pl.BlockSpec((tile, num_heads), lambda i: (i, 0)),       # er (dst tile)
                pl.BlockSpec((num_heads, n), lambda i: (0, 0)),          # el^T  resident
                pl.BlockSpec((n, ho), lambda i: (0, 0)),                 # feat  resident
                pl.BlockSpec((tile, n), lambda i: (i, 0)),               # adj_t tile
                pl.BlockSpec((num_heads, out_feats), lambda i: (0, 0))]  # bias
    args = [er, el_t, feat, adj_t, bias]
    if residual:
        # residual (Identity) input is only DMA'd when actually used
        in_specs.append(pl.BlockSpec((tile, in_feats), lambda i: (i, 0)))
        args.append(x)

    out = pl.pallas_call(
        kernel,
        grid=grid,
        out_shape=jax.ShapeDtypeStruct((n, ho), jnp.float32),
        in_specs=in_specs,
        out_specs=pl.BlockSpec((tile, ho), lambda i: (i, 0)),
        compiler_params=par,
    )(*args)
    return out


# ----------------------------- model (two layers) --------------------------- #

def init_params(key, in_size, hid_size, heads):
    h0, h1 = heads
    ks = jax.random.split(key, 8)

    def gl(k, shape, scale=0.2):
        return scale * jax.random.normal(k, shape, jnp.float32)

    return {
        # layer 1: GATConv(in_size, hid_size, heads[0], activation=elu)
        "w1": gl(ks[0], (in_size, h0 * hid_size)),
        "al1": gl(ks[1], (h0, hid_size)),
        "ar1": gl(ks[2], (h0, hid_size)),
        "b1": gl(ks[3], (h0, hid_size), scale=0.05),
        # layer 2: GATConv(hid*heads0, hid_size, heads[1], residual=True, activation=elu)
        "w2": gl(ks[4], (h0 * hid_size, h1 * hid_size)),
        "al2": gl(ks[5], (h1, hid_size)),
        "ar2": gl(ks[6], (h1, hid_size)),
        "b2": gl(ks[7], (h1, hid_size), scale=0.05),
    }


def gat_forward(params, adj_t, x, *, hid_size, heads, tile_rows=256):
    h0, h1 = heads
    h = gat_layer(x, params["w1"], params["al1"], params["ar1"], params["b1"],
                  adj_t, num_heads=h0, out_feats=hid_size, residual=False,
                  tile_rows=tile_rows)
    h = gat_layer(h, params["w2"], params["al2"], params["ar2"], params["b2"],
                  adj_t, num_heads=h1, out_feats=hid_size, residual=True,
                  tile_rows=tile_rows)
    return h


# -------------------------- pure-JAX reference (check) ---------------------- #

def gat_layer_ref(x, w, al, ar, b, adj_t, *, num_heads, out_feats, residual):
    n = x.shape[0]
    feat = (x @ w).reshape(n, num_heads, out_feats)
    el = jnp.sum(feat * al[None], axis=-1)            # (N, H)  src
    er = jnp.sum(feat * ar[None], axis=-1)            # (N, H)  dst
    e = er[:, None, :] + el[None, :, :]               # (N_dst, N_src, H)
    e = jnp.where(e > 0, e, 0.2 * e)
    mask = (adj_t > 0)[:, :, None]
    e = jnp.where(mask, e, -1e30)
    e = e - jnp.max(e, axis=1, keepdims=True)
    p = jnp.where(mask, jnp.exp(e), 0.0)
    alpha = p / jnp.sum(p, axis=1, keepdims=True)
    rst = jnp.einsum("vuh,uhd->vhd", alpha, feat)
    if residual:
        rst = rst + x.reshape(n, num_heads, out_feats)
    rst = rst + b[None]
    rst = jnp.where(rst > 0, rst, jnp.exp(rst) - 1.0)
    return rst.reshape(n, num_heads * out_feats)


def gat_forward_ref(params, adj_t, x, *, hid_size, heads):
    h0, h1 = heads
    h = gat_layer_ref(x, params["w1"], params["al1"], params["ar1"], params["b1"],
                      adj_t, num_heads=h0, out_feats=hid_size, residual=False)
    h = gat_layer_ref(h, params["w2"], params["al2"], params["ar2"], params["b2"],
                      adj_t, num_heads=h1, out_feats=hid_size, residual=True)
    return h


# ------------------------------------ main ---------------------------------- #

if __name__ == "__main__":
    N, in_size, hid_size = 16, 8, 16
    heads = (2, 2)   # heads[0] == heads[1] so layer-2 residual is Identity (as in DGL)

    key = jax.random.PRNGKey(0)
    kx, kg, kp = jax.random.split(key, 3)

    x = jax.random.normal(kx, (N, in_size), jnp.float32)

    # random directed graph + self-loops (avoids zero in-degree), stored transposed
    adj = (jax.random.uniform(kg, (N, N)) < 0.3).astype(jnp.float32)
    adj = jnp.maximum(adj, jnp.eye(N, dtype=jnp.float32))    # adj[src, dst]
    adj_t = adj.T                                            # adj_t[dst, src]

    params = init_params(kp, in_size, hid_size, heads)

    # tile_rows=8 exercises a real multi-tile grid (grid=(2,)) at this demo size;
    # at production sizes use 256..512 (halve on v7x: 64 MiB VMEM).
    out = gat_forward(params, adj_t, x, hid_size=hid_size, heads=heads, tile_rows=8)
    out = jax.block_until_ready(out)

    ref = gat_forward_ref(params, adj_t, x, hid_size=hid_size, heads=heads)
    assert out.shape == (N, heads[1] * hid_size), out.shape
    assert jnp.allclose(out, ref, atol=1e-4, rtol=1e-4), "mismatch vs reference"

    print("KERNEL_OK")
</pallas_src>

<mosaic_0001>
module attributes {stable_mosaic.version = 11 : i64} {
  func.func @_project_kernel(%arg0: i32, %arg1: memref<8x8xf32, #tpu.memory_space<vmem>>, %arg2: memref<8x32xf32, #tpu.memory_space<vmem>>, %arg3: memref<32x4xf32, #tpu.memory_space<vmem>>, %arg4: memref<8x32xf32, #tpu.memory_space<vmem>>, %arg5: memref<8x2xf32, #tpu.memory_space<vmem>>, %arg6: memref<8x2xf32, #tpu.memory_space<vmem>>) attributes {dimension_semantics = [#tpu.dimension_semantics<parallel>], iteration_bounds = array<i64: 2>, scalar_prefetch = 0 : i64, scratch_operands = 0 : i64, tpu.core_type = #tpu.core_type<tc>, window_params = [{transform_indices = @transform_0, window_bounds = array<i64: 8, 8>}, {pipeline_mode = #tpu.pipeline_mode<synchronous>, transform_indices = @transform_1, window_bounds = array<i64: 8, 32>}, {pipeline_mode = #tpu.pipeline_mode<synchronous>, transform_indices = @transform_2, window_bounds = array<i64: 32, 4>}, {transform_indices = @transform_3, window_bounds = array<i64: 8, 32>}, {transform_indices = @transform_4, window_bounds = array<i64: 8, 2>}, {transform_indices = @transform_5, window_bounds = array<i64: 8, 2>}]} {
    %c0 = arith.constant 0 : index
    %c0_0 = arith.constant 0 : index
    %0 = vector.load %arg1[%c0, %c0_0] : memref<8x8xf32, #tpu.memory_space<vmem>>, vector<8x8xf32>
    %c0_1 = arith.constant 0 : index
    %c0_2 = arith.constant 0 : index
    %1 = vector.load %arg2[%c0_1, %c0_2] : memref<8x32xf32, #tpu.memory_space<vmem>>, vector<8x32xf32>
    %cst = arith.constant dense<0.000000e+00> : vector<8x32xf32>
    %2 = tpu.matmul %0, %1, %cst {dimension_numbers = #tpu.dot_dimension_numbers<[1], [0], [0], [1], [0, 0, 1, 1], [], []>} : vector<8x8xf32>, vector<8x32xf32>, vector<8x32xf32> -> vector<8x32xf32>
    %c0_3 = arith.constant 0 : index
    %c0_4 = arith.constant 0 : index
    %3 = vector.load %arg4[%c0_3, %c0_4] : memref<8x32xf32, #tpu.memory_space<vmem>>, vector<8x32xf32>
    tpu.vector_store %arg4[%c0_3, %c0_4], %2 {strides = array<i32>} : memref<8x32xf32, #tpu.memory_space<vmem>>, vector<8x32xf32>,
    %c0_5 = arith.constant 0 : index
    %c0_6 = arith.constant 0 : index
    %4 = vector.load %arg3[%c0_5, %c0_6] : memref<32x4xf32, #tpu.memory_space<vmem>>, vector<32x4xf32>
    %cst_7 = arith.constant dense<0.000000e+00> : vector<8x4xf32>
    %5 = tpu.matmul %2, %4, %cst_7 {dimension_numbers = #tpu.dot_dimension_numbers<[1], [0], [0], [1], [0, 0, 1, 1], [], []>} : vector<8x32xf32>, vector<32x4xf32>, vector<8x4xf32> -> vector<8x4xf32>
    %6 = vector.extract_strided_slice %5 {offsets = [0, 0], sizes = [8, 2], strides = [1, 1]} : vector<8x4xf32> to vector<8x2xf32>
    %c0_8 = arith.constant 0 : index
    %c0_9 = arith.constant 0 : index
    %7 = vector.load %arg5[%c0_8, %c0_9] : memref<8x2xf32, #tpu.memory_space<vmem>>, vector<8x2xf32>
    tpu.vector_store %arg5[%c0_8, %c0_9], %6 {strides = array<i32>} : memref<8x2xf32, #tpu.memory_space<vmem>>, vector<8x2xf32>,
    %8 = vector.extract_strided_slice %5 {offsets = [0, 2], sizes = [8, 2], strides = [1, 1]} : vector<8x4xf32> to vector<8x2xf32>
    %c0_10 = arith.constant 0 : index
    %c0_11 = arith.constant 0 : index
    %9 = vector.load %arg6[%c0_10, %c0_11] : memref<8x2xf32, #tpu.memory_space<vmem>>, vector<8x2xf32>
    tpu.vector_store %arg6[%c0_10, %c0_11], %8 {strides = array<i32>} : memref<8x2xf32, #tpu.memory_space<vmem>>, vector<8x2xf32>,
    return
  }
  func.func @transform_0(%arg0: i32) -> (i32, i32) {
    %c0_i32 = arith.constant 0 : i32
    %c0_i32_0 = arith.constant 0 : i32
    return %arg0, %c0_i32 : i32, i32
  }
  func.func @transform_1(%arg0: i32) -> (i32, i32) {
    %c0_i32 = arith.constant 0 : i32
    %c0_i32_0 = arith.constant 0 : i32
    %c0_i32_1 = arith.constant 0 : i32
    return %c0_i32, %c0_i32_0 : i32, i32
  }
  func.func @transform_2(%arg0: i32) -> (i32, i32) {
    %c0_i32 = arith.constant 0 : i32
    %c0_i32_0 = arith.constant 0 : i32
    %c0_i32_1 = arith.constant 0 : i32
    return %c0_i32, %c0_i32_0 : i32, i32
  }
  func.func @transform_3(%arg0: i32) -> (i32, i32) {
    %c0_i32 = arith.constant 0 : i32
    %c0_i32_0 = arith.constant 0 : i32
    return %arg0, %c0_i32 : i32, i32
  }
  func.func @transform_4(%arg0: i32) -> (i32, i32) {
    %c0_i32 = arith.constant 0 : i32
    %c0_i32_0 = arith.constant 0 : i32
    return %arg0, %c0_i32 : i32, i32
  }
  func.func @transform_5(%arg0: i32) -> (i32, i32) {
    %c0_i32 = arith.constant 0 : i32
    %c0_i32_0 = arith.constant 0 : i32
    return %arg0, %c0_i32 : i32, i32
  }
}

</mosaic_0001>

<bundles_post_ra>
// kernel: tpu_custom_call.1
= control target key start
LH: loop header
LB: loop body
LE: loop exit
PB: predicated region body
PF: predicated region fallthrough
CT: control target
= control target key end

     0   :  { %11 = vsyncpa [#allocation3], 0  ;;  %s843_s0 = inlined_call_operand.vmem [shape: f32[16,8], index: 0, kind: input, shape index: {}]   ;;  %s844_s1 = inlined_call_operand.vmem [shape: f32[8,32], index: 1, kind: input, shape index: {}]   ;;  %s845_s2 = inlined_call_operand.vmem [shape: f32[32,4], index: 2, kind: input, shape index: {}]   ;;  %s846_s3 = inlined_call_operand.hbm [shape: f32[16,32], index: 3, kind: output, shape index: {0}]   ;;  %s847_s4 = inlined_call_operand.vmem [shape: f32[16,2], index: 4, kind: output, shape index: {1}]   ;;  %s848_s5 = inlined_call_operand.vmem [shape: f32[16,2], index: 5, kind: output, shape index: {2}]  }
   0x1   :  { %13 = vsyncpa [#allocation3 + $0x1], 0  ;;  %s723_s18 = smov 0   ;;  %s725_s19 = smov 0  }
   0x2   :  { %s727_s20 = smov 0   ;;  %s729_s21 = smov 0  }
   0x3 LB: > { %s744_s22 = sadd.s32 4294967295, %s686_s21   ;;  %s538_s23 = sadd.s32 4294967294, %s686_s21   ;;  %s686_s21 = sphi %s729_s21, %s854_s21   ;;  %s682_s20 = sphi %s727_s20, %s853_s20   ;;  %s678_s19 = sphi %s725_s19, %s852_s19   ;;  %s674_s18 = sphi %s723_s18, %s851_s18  }
   0x4   : > { %s748_s24 = sadd.s32 1, %s686_s21   ;;  %s94_s25 = sadd.s32 1, %s682_s20 }
   0x5   : > { %s91_s26 = ssub.s32 %s686_s21, %s748_s24  ;;  %p104_p0 = scmp.ne.s32.totalorder %s682_s20, %s678_s19 }
   0x6   : > { %p92_p1 = scmp.eq.s32.totalorder %s91_s26, 0  ;;  %p105_p2 = scmp.eq.s32.totalorder %s744_s22, 1 }
   0x7   : > { %p110_p3 = scmp.ne.s32.totalorder %s678_s19, %s674_s18  ;;  %p111_p4 = scmp.eq.s32.totalorder %s538_s23, 1 }
   0x8   : > { %s759_s27 = scalar_select %p92_p1, %s682_s20, %s94_s25  }
   0x9   : > { %p761_p5 = por %p105_p2, %p104_p0  ;;  %p765_p6 = por %p111_p4, %p110_p3 }
   0xa   : > { %p541_p7 = scmp.ge.s32.totalorder %s686_s21, 1  ;;  %p194_p8 = scmp.lt.s32.totalorder %s686_s21, 3 }
   0xc   : > { %p195_p9 = pnand %p541_p7, %p194_p8 }
   0xd   : > { %v242_v0 = vld [vmem:[%s844_s1] sm:$0xff] (!%p195_p9)  ;;  %p229_p10 = scmp.lt.s32.totalorder (!%p195_p9), %s744_s22, 1  ;;  %v688_v1 = vmov (!%p195_p9), 0.0   ;;  %vm689_vm0 = vmmov (!%p195_p9), 0   ;;  %v320_v3 = vld [vmem:[%s845_s2 + $0x8] sm:$0xff] (!%p195_p9)  ;;  %v321_v4 = vld [vmem:[%s845_s2 + $0x10] sm:$0xff] (!%p195_p9) }
   0xe   : > { %198 = sbr.rel (%p195_p9) target bundleno = 566 (0x236), region = 32  ;;  %559 = vmatprep.subr.mxu0 (!%p195_p9), %v688_v1  ;;  %561 = vmatprep.mubr.msk.f32.mxu0 (!%p195_p9), %vm689_vm0, %v688_v1  ;;  %v319_v2 = vld [vmem:[%s845_s2] sm:$0xff] (!%p195_p9)  ;;  %v690_v5 = vmov (!%p195_p9), 0.0|0.0   ;;  %v322_v7 = vld [vmem:[%s845_s2 + $0x18] sm:$0xff] (!%p195_p9)  ;;  %vm243_vm1 = vcmask (!%p195_p9), 64512   ;;  %s214_s26 = sand.u32 (!%p195_p9), 1, %s678_s19  }
   0xf   : > { %560 = vmatpush3.msra.mxu0 (!%p195_p9), %v242_v0  ;;  %575 = vmatprep.subr.bf16.mxu1 (!%p195_p9), %v690_v5  ;;  %v576_v6 = vpack.c.bf16 (!%p195_p9), %v320_v3, %v319_v2  ;;  %v579_v8 = vpack.c.bf16 (!%p195_p9), %v322_v7, %v321_v4  ;;  %s542_s30 = sshll.u32 (!%p195_p9), %s214_s26, 3  ;;  %vm317_vm2 = vcmask (!%p195_p9), 261120   ;;  %s549_s7 = sshll.u32 (!%p195_p9), %s744_s22, 7 }
  0x10   : > { %572 = vmatprep.mubr.msk.f32.mxu1 (!%p195_p9), %vm689_vm0, %v688_v1  ;;  %s216_s6 = scalar_lea.vmem (!%p195_p9), [#allocation2], %s542_s30  ;;  %s799_s11 = scalar_lea.hbm (!%p195_p9), %s846_s3, %s549_s7 }
  0x11   : > { %577 = vmatpush3.bf16.msra.mxu1 (!%p195_p9), %v576_v6  ;;  %s425_s8 = sshll.u32 (!%p195_p9), %s216_s6, 4  ;;  %s404_s12 = scalar_lea.sflag (!%p195_p9), [#allocation3], %s214_s26  ;;  %s426_s8 = int_to_ptr.vmem [resolvable:$true] %s425_s8 }
  0x12   : > { %578 = vmatprep.subr.bf16.mxu1 (!%p195_p9), %v690_v5  ;;  %s691_s14 = smov (!%p195_p9), [#allocation2]  }
  0x13   : > { %s628_s15 = sshll.u32 (!%p195_p9), %s691_s14, 4  ;;  %s629_s15 = int_to_ptr.vmem [resolvable:$false] %s628_s15 }
  0x14   : > { %s630_s17 = scalar_lea.vmem (!%p195_p9), %s629_s15, 256  ;;  %p631_p0 = scmp.lt.s32.totalorder (!%p195_p9), %s426_s8, %s629_s15 }
  0x15   : > { %s230_s13 = scalar_select %p229_p10, %s744_s22, 1  ;;  %580 = vmatpush3.bf16.msra.mxu1 %v579_v8 }
  0x17   : > { %s788_s16 = sshll.u32 %s230_s13, 3  ;;  %s624_s13 = scalar_lea.vmem %s426_s8, 128 }
  0x18   : > { %s232_s25 = scalar_lea.vmem %s843_s0, %s788_s16  ;;  %p625_p11 = scmp.ne.s32.totalorder %s426_s8, %s624_s13 }
  0x19   : > { %v241_v9 = vld [vmem:[%s232_s25] sm:$0xff]  ;;  %p632_p1 = scmp.lt.s32.totalorder %s630_s17, %s624_s13 }
  0x1a   : > { %562 = vmatmul.mubr.msk.f32.vlgmr.msra.gmra.mrb[0].mxu0 %vm243_vm1, %v241_v9  ;;  %p626_p12 = pnand %p625_p11, %p761_p5 }
  0x1b   : > { %p633_p2 = por %p632_p1, %p631_p0 }
  0x1c   : > { %p627_p13 = pneg %p626_p12 }
  0x1e   : > { %p634_p3 = pnand %p633_p2, %p627_p13 }
  0xed   : > { %v313_v10 = vpop.f32.mrb[0].mxu0 }
  0xee   : > { %318 = vst.msk [vmem:[%s216_s6] sm:$0xff] %vm317_vm2, %v313_v10  ;;  %v563_v11 = vpop.f32.mrb[1].mxu0  ;;  %573 = vmatmul.mubr.msk.f32.vlgmr.msra.gmra.mrb[0].mxu1 %vm317_vm2, %v313_v10 }
  0xef   : > { %637 = shalt.err (!%p634_p3)
}
  0xf0   : > { %s638_s22 = scalar_lea.hbm %s799_s11, 128  ;;  %s642_s26 = scalar_lea.hbm %s846_s3, 256 }
  0xf1   : > { %p639_p4 = scmp.ne.s32.totalorder %s799_s11, %s638_s22  ;;  %p643_p9 = scmp.lt.u32.totalorder %s799_s11, %s846_s3 }
  0xf2   : > { %p644_p10 = scmp.lt.u32.totalorder %s642_s26, %s638_s22  ;;  %p646_p12 = scmp.lt.u32.totalorder %s638_s22, %s799_s11 }
  0xf3   : > { %p640_p7 = pnand %p639_p4, %p761_p5 }
  0xf4   : > { %p645_p11 = por %p644_p10, %p643_p9 }
  0xf5   : > { %p641_p8 = pneg %p640_p7 }
  0xf6   : > { %p647_p13 = por %p646_p12, %p645_p11 }
  0xf8   : > { %p648_p0 = pnand %p647_p13, %p641_p8 }
  0xfa   : > { %651 = shalt.err (!%p648_p0)
}
  0xfb   : > { %581 = dma.vmem_to_hbm [thread:$0]  (%p761_p5), %s426_s8, 128, %s799_s11, %s404_s12   ;;  %vm396_vm3 = vcmask 15360  }
  0xfc   : > { %s236_s10 = scalar_lea.vmem %s847_s4, %s788_s16  ;;  %s692_s13 = smov 126  }
  0xfd   : > { %s240_s17 = scalar_lea.vmem %s848_s5, %s788_s16 }
 0x1c1   : > { %v392_v12 = vpop.f32.mrb[0].mxu1 }
 0x1c2   : > { %397 = vst.msk [vmem:[%s236_s10] sm:$0xff] %vm396_vm3, %v392_v12  ;;  %v574_v13 = vpop.f32.mrb[1].mxu1  ;;  %399 = vrot.lane.b32.xlu0 %v392_v12, %s692_s13 }
 0x234   : > { %v400_v14 = vpop.permute.xlu0 %399 }
 0x235   : > { %402 = vst.msk [vmem:[%s240_s17] sm:$0xff] %vm396_vm3, %v400_v14 }
 0x236 PF: > { %p587_p5 = scmp.ge.s32.totalorder %s686_s21, 2  ;;  %s443_s28 = sand.u32 1, %s674_s18  }
 0x237   : > { %s444_s8 = scalar_lea.sflag [#allocation3], %s443_s28 }
 0x238   : > { %p584_p1 = pnand %p587_p5, %p765_p6 }
 0x23a   : > { %669 = dma.done.wait (!%p584_p1), %s444_s8, 128  }
 0x23b   : > { %671 = vsyncadd (!%p584_p1), %s444_s8, 4294967168  ;;  %p16_p2 = scmp.ge.s32.totalorder %s748_s24, 4   ;;  %s851_s18 = smov %s678_s19 }
 0x23c   : > { %s852_s19 = smov %s682_s20  ;;  %s853_s20 = smov %s759_s27 }
 0x23d   : > { %s854_s21 = smov %s748_s24  ;;  %18 = sbr.rel (!%p16_p2) target bundleno = 3 (0x3), region = 91 }
 0x244   :  { %463 = vsyncpa [#allocation3], 1 }
 0x245   :  { %465 = vsyncpa [#allocation3 + $0x1], 1 }

</bundles_post_ra>
